<compile_context>
chip_gen: v7x
topology: tpu7x:2x2x1
jax: 0.10.0
libtpu: 0.0.40
codegen_flags: <defaults>
</compile_context>

<pallas_src>
import functools

import jax
import jax.numpy as jnp
from jax import lax
from jax.experimental import pallas as pl
from jax.experimental.pallas import tpu as pltpu

LANES = 128
TM_MAX = 4096   # 2 MiB per f32 input tile; keeps double-buffered inputs at 8 MiB
MIN_GRID = 4    # aim for >= 4 grid steps so both v7x TCs + DMA pipeline stay busy


def _round_up(a, b):
    return -(-a // b) * b


def _focal_loss_kernel(x_ref, t_ref, p_ref, *, gamma, alpha, rows, tm,
                       needs_row_mask, binary_targets, inv_n):
    i = pl.program_id(0)

    x = x_ref[...].astype(jnp.float32)
    t = t_ref[...].astype(jnp.float32)

    if binary_targets:
        # Valid only for targets in {0, 1}:
        #   s = (1-2t) * x;  bce = softplus(s);  p_t = sigmoid(-s)
        s = (1.0 - 2.0 * t) * x
        e = jnp.exp(-jnp.abs(s))
        bce = jnp.maximum(s, 0.0) + jnp.log1p(e)
        # sigmoid(-s) = where(s>=0, e, 1) / (1+e); vrcp is near-free on EUP.
        p_t = jnp.where(s >= 0.0, e, 1.0) * pl.reciprocal(1.0 + e, approx=True)
    else:
        # Numerically stable BCE-with-logits (general soft-target path):
        #   bce = max(x, 0) - x*t + log1p(exp(-|x|))
        bce = jnp.maximum(x, 0.0) - x * t + jnp.log1p(jnp.exp(-jnp.abs(x)))
        p_t = jnp.exp(-bce)

    # alpha*t + (1-alpha)*(1-t) == (2*alpha-1)*t + (1-alpha)   (one mul + add)
    alpha_factor = jnp.float32(2.0 * alpha - 1.0) * t + jnp.float32(1.0 - alpha)
    m = jnp.maximum(1.0 - p_t, 0.0)  # clamp: exp(-bce) can round just above 1
    if float(gamma).is_integer():
        modulating_factor = lax.integer_pow(m, int(gamma))   # VPU muls only
    else:
        modulating_factor = m ** jnp.float32(gamma)          # EUP exp/log
    fl = alpha_factor * modulating_factor * bce

    def _partial(v):
        # (tm,128) -> (tm//8, 8, 128) is a free relayout; sum over the leading
        # axis is pure vreg adds (VALU).  Pre-scale by 1/N so the JAX epilogue
        # is a bare sum.
        part = jnp.sum(v.reshape(tm // 8, 8, LANES), axis=0) * jnp.float32(inv_n)
        return part.reshape(1, 8, LANES)

    if needs_row_mask:
        last = pl.num_programs(0) - 1

        @pl.when(i != last)
        def _():
            p_ref[...] = _partial(fl)

        @pl.when(i == last)
        def _():
            # Only the last block can contain rows past the true extent.
            row = lax.broadcasted_iota(jnp.int32, fl.shape, 0)
            valid = row < (rows - i * tm)
            p_ref[...] = _partial(jnp.where(valid, fl, 0.0))
    else:
        p_ref[...] = _partial(fl)


def _focal_elementwise_jax(x, t, gamma, alpha):
    """Plain-JAX focal loss (per-element) for tiny tails / tiny inputs."""
    x = x.astype(jnp.float32)
    t = t.astype(jnp.float32)
    bce = jnp.maximum(x, 0.0) - x * t + jnp.log1p(jnp.exp(-jnp.abs(x)))
    p_t = jnp.exp(-bce)
    alpha_factor = alpha * t + (1.0 - alpha) * (1.0 - t)
    modulating_factor = jnp.maximum(1.0 - p_t, 0.0) ** gamma
    return alpha_factor * modulating_factor * bce


def focal_loss(inputs, targets, gamma=2.0, alpha=0.25, binary_targets=False):
    """Pallas TPU implementation of FocalLoss.forward (mean reduction).

    Pass logits/targets in their producer dtype (bf16 / int) -- the kernel
    casts to f32 in VMEM.  Set `binary_targets=True` only when targets are
    strictly {0, 1} to enable the reduced-EUP fast path.
    """
    assert inputs.shape == targets.shape
    n_total = int(inputs.size)
    assert n_total > 0
    inv_n = 1.0 / n_total

    x = inputs.reshape(-1)
    t = targets.reshape(-1)

    rows = n_total // LANES
    rem = n_total % LANES
    use_kernel = rows >= 8                      # tiny inputs: all-JAX path
    n_main = rows * LANES if use_kernel else 0

    total = jnp.float32(0.0)

    if use_kernel:
        # Free reshape when n_total % 128 == 0; otherwise only the lane-dense
        # prefix is sliced (no full-array zero-pad copy of both inputs).
        if rem == 0:
            x2 = x.reshape(rows, LANES)
            t2 = t.reshape(rows, LANES)
        else:
            x2 = x[:n_main].reshape(rows, LANES)
            t2 = t[:n_main].reshape(rows, LANES)

        # tm: multiple of 8 (pure-VALU reduction path), capped for VMEM
        # portability, and small enough that the grid has >= MIN_GRID blocks
        # for large inputs (v7x megacore + double-buffering).
        tm = min(TM_MAX, max(8, _round_up(pl.cdiv(rows, MIN_GRID), 8)))
        grid = pl.cdiv(rows, tm)
        needs_row_mask = (grid * tm) != rows

        kernel = functools.partial(
            _focal_loss_kernel, gamma=gamma, alpha=alpha, rows=rows, tm=tm,
            needs_row_mask=needs_row_mask, binary_targets=binary_targets,
            inv_n=inv_n)

        partials = pl.pallas_call(
            kernel,
            out_shape=jax.ShapeDtypeStruct((grid, 8, LANES), jnp.float32),
            grid_spec=pltpu.PrefetchScalarGridSpec(
                num_scalar_prefetch=0,
                grid=(grid,),
                in_specs=[
                    pl.BlockSpec((tm, LANES), lambda i: (i, 0)),
                    pl.BlockSpec((tm, LANES), lambda i: (i, 0)),
                ],
                out_specs=pl.BlockSpec((1, 8, LANES), lambda i: (i, 0, 0)),
            ),
            compiler_params=pltpu.CompilerParams(
                dimension_semantics=("parallel",),
            ),
        )(x2, t2)

        total = total + jnp.sum(partials)       # partials already carry 1/N

    if n_main < n_total:
        # <= 127-element tail (or the whole tiny input) in plain JAX.
        fl_tail = _focal_elementwise_jax(x[n_main:], t[n_main:], gamma, alpha)
        total = total + jnp.sum(fl_tail) * jnp.float32(inv_n)

    return total


def focal_loss_ref(inputs, targets, gamma=2.0, alpha=0.25):
    x = inputs.astype(jnp.float32)
    t = targets.astype(jnp.float32)
    bce = jnp.maximum(x, 0.0) - x * t + jnp.log1p(jnp.exp(-jnp.abs(x)))
    p_t = jnp.exp(-bce)
    alpha_factor = alpha * t + (1.0 - alpha) * (1.0 - t)
    modulating_factor = (1.0 - p_t) ** gamma
    return jnp.mean(alpha_factor * modulating_factor * bce)


if __name__ == "__main__":
    key = jax.random.PRNGKey(0)
    k1, k2, k3, k4 = jax.random.split(key, 4)

    # NCHW-like small shape: batch=2, channels=4, spatial=16x16 (2048 elems,
    # a multiple of 128 -> zero-copy lane-dense path).
    shape = (2, 4, 16, 16)
    logits = jax.random.normal(k1, shape, dtype=jnp.float32)
    targets = (jax.random.uniform(k2, shape) > 0.5).astype(jnp.float32)

    ref = focal_loss_ref(logits, targets, gamma=2.0, alpha=0.25)

    # General (soft-target) path: exact math, tight tolerance.
    loss = focal_loss(logits, targets, gamma=2.0, alpha=0.25)
    loss = jax.block_until_ready(loss)
    assert jnp.allclose(loss, ref, rtol=1e-5, atol=1e-6), (loss, ref)

    # Binary-target fast path (1 fewer exp + approx EUP reciprocal): slightly
    # looser tolerance because of the approximate reciprocal.
    loss_bin = focal_loss(logits, targets, gamma=2.0, alpha=0.25,
                          binary_targets=True)
    loss_bin = jax.block_until_ready(loss_bin)
    assert jnp.allclose(loss_bin, ref, rtol=2e-3, atol=2e-4), (loss_bin, ref)

    # Ragged shape (3264 elems, not a multiple of 128 and not a multiple of
    # the grid): exercises the last-block row mask + plain-JAX tail.
    shape2 = (3, 4, 16, 17)
    logits2 = jax.random.normal(k3, shape2, dtype=jnp.float32)
    targets2 = (jax.random.uniform(k4, shape2) > 0.5).astype(jnp.float32)
    loss2 = focal_loss(logits2, targets2, gamma=2.0, alpha=0.25)
    loss2 = jax.block_until_ready(loss2)
    ref2 = focal_loss_ref(logits2, targets2, gamma=2.0, alpha=0.25)
    assert jnp.allclose(loss2, ref2, rtol=1e-5, atol=1e-6), (loss2, ref2)

    print("KERNEL_OK")
</pallas_src>

<mosaic_0001>
module attributes {stable_mosaic.version = 11 : i64} {
  func.func @_focal_loss_kernel(%arg0: i32, %arg1: memref<8x128xf32, #tpu.memory_space<vmem>>, %arg2: memref<8x128xf32, #tpu.memory_space<vmem>>, %arg3: memref<1x8x128xf32, #tpu.memory_space<vmem>>) attributes {dimension_semantics = [#tpu.dimension_semantics<parallel>], iteration_bounds = array<i64: 2>, scalar_prefetch = 0 : i64, scratch_operands = 0 : i64, tpu.core_type = #tpu.core_type<tc>, window_params = [{transform_indices = @transform_0, window_bounds = array<i64: 8, 128>}, {transform_indices = @transform_1, window_bounds = array<i64: 8, 128>}, {transform_indices = @transform_2, window_bounds = array<i64: 1, 8, 128>}]} {
    %c0 = arith.constant 0 : index
    %c0_0 = arith.constant 0 : index
    %0 = vector.load %arg1[%c0, %c0_0] : memref<8x128xf32, #tpu.memory_space<vmem>>, vector<8x128xf32>
    %c0_1 = arith.constant 0 : index
    %c0_2 = arith.constant 0 : index
    %1 = vector.load %arg2[%c0_1, %c0_2] : memref<8x128xf32, #tpu.memory_space<vmem>>, vector<8x128xf32>
    %cst = arith.constant 0.000000e+00 : f32
    %2 = vector.broadcast %cst : f32 to vector<8x128xf32>
    %3 = arith.maximumf %0, %2 : vector<8x128xf32>
    %4 = arith.mulf %0, %1 : vector<8x128xf32>
    %5 = arith.subf %3, %4 : vector<8x128xf32>
    %6 = math.absf %0 : vector<8x128xf32>
    %cst_3 = arith.constant 0.000000e+00 : f32
    %7 = vector.broadcast %cst_3 : f32 to vector<8x128xf32>
    %8 = arith.subf %7, %6 : vector<8x128xf32>
    %9 = math.exp %8 : vector<8x128xf32>
    %10 = math.log1p %9 : vector<8x128xf32>
    %11 = arith.addf %5, %10 : vector<8x128xf32>
    %cst_4 = arith.constant 0.000000e+00 : f32
    %12 = vector.broadcast %cst_4 : f32 to vector<8x128xf32>
    %13 = arith.subf %12, %11 : vector<8x128xf32>
    %14 = math.exp %13 : vector<8x128xf32>
    %cst_5 = arith.constant -5.000000e-01 : f32
    %15 = vector.broadcast %cst_5 : f32 to vector<8x128xf32>
    %16 = arith.mulf %15, %1 : vector<8x128xf32>
    %cst_6 = arith.constant 7.500000e-01 : f32
    %17 = vector.broadcast %cst_6 : f32 to vector<8x128xf32>
    %18 = arith.addf %16, %17 : vector<8x128xf32>
    %cst_7 = arith.constant 1.000000e+00 : f32
    %19 = vector.broadcast %cst_7 : f32 to vector<8x128xf32>
    %20 = arith.subf %19, %14 : vector<8x128xf32>
    %cst_8 = arith.constant 0.000000e+00 : f32
    %21 = vector.broadcast %cst_8 : f32 to vector<8x128xf32>
    %22 = arith.maximumf %20, %21 : vector<8x128xf32>
    %23 = arith.mulf %22, %22 : vector<8x128xf32>
    %24 = arith.mulf %18, %23 : vector<8x128xf32>
    %25 = arith.mulf %24, %11 : vector<8x128xf32>
    %26 = vector.shape_cast %25 : vector<8x128xf32> to vector<1x8x128xf32>
    %cst_9 = arith.constant dense<0.000000e+00> : vector<8x128xf32>
    %27 = vector.multi_reduction <add>, %26, %cst_9 [0] : vector<1x8x128xf32> to vector<8x128xf32>
    %cst_10 = arith.constant 4.8828125E-4 : f32
    %28 = vector.broadcast %cst_10 : f32 to vector<8x128xf32>
    %29 = arith.mulf %27, %28 : vector<8x128xf32>
    %30 = vector.shape_cast %29 : vector<8x128xf32> to vector<1x8x128xf32>
    %c0_11 = arith.constant 0 : index
    %c0_12 = arith.constant 0 : index
    %c0_13 = arith.constant 0 : index
    %31 = vector.load %arg3[%c0_11, %c0_12, %c0_13] : memref<1x8x128xf32, #tpu.memory_space<vmem>>, vector<1x8x128xf32>
    tpu.vector_store %arg3[%c0_11, %c0_12, %c0_13], %30 {strides = array<i32>} : memref<1x8x128xf32, #tpu.memory_space<vmem>>, vector<1x8x128xf32>,
    return
  }
  func.func @transform_0(%arg0: i32) -> (i32, i32) {
    %c0_i32 = arith.constant 0 : i32
    %c0_i32_0 = arith.constant 0 : i32
    return %arg0, %c0_i32 : i32, i32
  }
  func.func @transform_1(%arg0: i32) -> (i32, i32) {
    %c0_i32 = arith.constant 0 : i32
    %c0_i32_0 = arith.constant 0 : i32
    return %arg0, %c0_i32 : i32, i32
  }
  func.func @transform_2(%arg0: i32) -> (i32, i32, i32) {
    %c0_i32 = arith.constant 0 : i32
    %c0_i32_0 = arith.constant 0 : i32
    %c0_i32_1 = arith.constant 0 : i32
    return %arg0, %c0_i32, %c0_i32_0 : i32, i32, i32
  }
}

</mosaic_0001>

<bundles_post_ra>
// kernel: tpu_custom_call.1
= control target key start
LH: loop header
LB: loop body
LE: loop exit
PB: predicated region body
PF: predicated region fallthrough
CT: control target
= control target key end

     0   :  { %7 = vsyncpa [#allocation3], 0  ;;  %s771_s0 = inlined_call_operand.hbm [shape: f32[16,128], index: 0, kind: input, shape index: {}]   ;;  %s772_s1 = inlined_call_operand.hbm [shape: f32[16,128], index: 1, kind: input, shape index: {}]   ;;  %s773_s2 = inlined_call_operand.hbm [shape: f32[2,8,128], index: 2, kind: output, shape index: {}]  }
   0x1   :  { %9 = vsyncpa [#allocation3 + $0x1], 0 }
   0x2   :  { %10 = vsyncpa [#allocation6], 0 }
   0x3   :  { %12 = vsyncpa [#allocation6 + $0x1], 0 }
   0x4   :  { %13 = vsyncpa [#allocation4], 0 }
   0x5   :  { %15 = vsyncpa [#allocation4 + $0x1], 0  ;;  %s557_s9 = smov 0   ;;  %s559_s10 = smov 0  }
   0x6   :  { %s561_s11 = smov 0   ;;  %s563_s12 = smov 0  }
   0x7 LB: > { %s578_s13 = sadd.s32 4294967295, %s537_s12   ;;  %s335_s14 = sadd.s32 4294967294, %s537_s12   ;;  %s537_s12 = sphi %s563_s12, %s792_s12   ;;  %s533_s11 = sphi %s561_s11, %s791_s11   ;;  %s529_s10 = sphi %s559_s10, %s790_s10   ;;  %s525_s9 = sphi %s557_s9, %s789_s9  }
   0x8   : > { %s582_s15 = sadd.s32 1, %s537_s12   ;;  %s28_s16 = sadd.s32 1, %s533_s11 }
   0x9   : > { %s25_s17 = ssub.s32 %s537_s12, %s582_s15  ;;  %p35_p0 = scmp.ne.s32.totalorder %s533_s11, %s529_s10 }
   0xa   : > { %p26_p1 = scmp.eq.s32.totalorder %s25_s17, 0  ;;  %p36_p2 = scmp.eq.s32.totalorder %s537_s12, 0 }
   0xb   : > { %p41_p3 = scmp.ne.s32.totalorder %s529_s10, %s525_s9  ;;  %p42_p4 = scmp.eq.s32.totalorder %s578_s13, 0 }
   0xc   : > { %s594_s18 = scalar_select %p26_p1, %s533_s11, %s28_s16  }
   0xd   : > { %p596_p5 = por %p36_p2, %p35_p0  ;;  %p600_p6 = por %p42_p4, %p41_p3 }
   0xe   : > { %p91_p7 = scmp.eq.s32.totalorder %s578_s13, 1  ;;  %p97_p8 = scmp.eq.s32.totalorder %s335_s14, 1 }
   0xf   : > { %s777_s20 = scalar_select %p600_p6, 1, 0 }
  0x10   : > { %p367_p10 = scmp.lt.s32.totalorder %s537_s12, 2  ;;  %p607_p11 = por %p91_p7, %p35_p0 }
  0x11   : > { %p611_p12 = por %p97_p8, %p41_p3  ;;  %s616_s23 = sand.u32 1, %s533_s11  }
  0x12   : > { %s778_s21 = scalar_select %p607_p11, 1, 0 }
  0x13   : > { %s779_s22 = scalar_select %p611_p12, 1, 0 }
  0x14   : > { %s339_s24 = sshll.u32 %s537_s12, 7  ;;  %s338_s25 = sshll.u32 %s616_s23, 3 }
  0x15   : > { %s625_s28 = scalar_lea.hbm %s771_s0, %s339_s24  ;;  %s121_s29 = scalar_lea.vmem [#allocation2], %s338_s25 }
  0x16   : > { %s128_s30 = sshll.u32 %s121_s29, 4  ;;  %p631_p13 = pnand %p367_p10, %p596_p5  ;;  %s635_s30 = int_to_ptr.vmem [resolvable:$true] %s128_s30 }
  0x17   : > { %s118_s4 = scalar_lea.sflag [#allocation3], %s616_s23  ;;  %s407_s5 = scalar_lea.hbm %s625_s28, 128 }
  0x18   : > { %p408_p2 = scmp.ne.s32.totalorder %s625_s28, %s407_s5  ;;  %p409_p3 = pneg %p631_p13 }
  0x19   : > { %s412_s8 = scalar_lea.hbm %s771_s0, 256  ;;  %p413_p5 = scmp.lt.u32.totalorder %s625_s28, %s771_s0 }
  0x1a   : > { %p410_p4 = pnand %p409_p3, %p408_p2  ;;  %p414_p8 = scmp.lt.u32.totalorder %s412_s8, %s407_s5 }
  0x1b   : > { %p416_p9 = scmp.lt.u32.totalorder %s407_s5, %s625_s28 }
  0x1c   : > { %p411_p7 = pneg %p410_p4  ;;  %p415_p10 = por %p414_p8, %p413_p5 }
  0x1e   : > { %p417_p0 = por %p416_p9, %p415_p10 }
  0x20   : > { %p418_p1 = pnand %p417_p0, %p411_p7 }
  0x22   : > { %421 = shalt.err (!%p418_p1)
}
  0x23   : > { %s422_s17 = scalar_lea.vmem %s635_s30, 128  ;;  %s539_s19 = smov [#allocation2]  }
  0x24   : > { %p423_p2 = scmp.ne.s32.totalorder %s635_s30, %s422_s17  ;;  %s427_s26 = sshll.u32 %s539_s19, 4  ;;  %s428_s26 = int_to_ptr.vmem [resolvable:$false] %s427_s26 }
  0x25   : > { %s429_s27 = scalar_lea.vmem %s428_s26, 256  ;;  %p430_p11 = scmp.lt.s32.totalorder %s635_s30, %s428_s26 }
  0x26   : > { %p425_p4 = pnand %p423_p2, %p409_p3  ;;  %p431_p5 = scmp.lt.s32.totalorder %s429_s27, %s422_s17 }
  0x28   : > { %p426_p12 = pneg %p425_p4  ;;  %p432_p8 = por %p431_p5, %p430_p11 }
  0x2a   : > { %p433_p9 = pnand %p432_p8, %p426_p12 }
  0x2c   : > { %436 = shalt.err (!%p433_p9)
}
  0x2d   : > { %359 = dma.hbm_to_vmem [thread:$0]  (!%p631_p13), %s625_s28, 128, %s635_s30, %s118_s4  }
  0x2e   : > { %p781_p0 = scmp.lt.s32.totalorder %s537_s12, 3  ;;  %p782_p1 = scmp.ge.s32.totalorder %s537_s12, 1 }
  0x2f   : > { %s678_s7 = scalar_lea.hbm %s772_s1, %s339_s24  ;;  %s139_s8 = scalar_lea.vmem [#allocation5], %s338_s25 }
  0x30   : > { %p669_p7 = pnand %p782_p1, %p781_p0  ;;  %s146_s14 = sshll.u32 %s139_s8, 4  ;;  %s147_s14 = int_to_ptr.vmem [resolvable:$true] %s146_s14 }
  0x31   : > { %s136_s28 = scalar_lea.sflag [#allocation6], %s616_s23  ;;  %s437_s30 = scalar_lea.hbm %s678_s7, 128 }
  0x32   : > { %s783_s29 = scalar_select %p669_p7, 1, 0 }
  0x33   : > { %p438_p11 = scmp.ne.s32.totalorder %s678_s7, %s437_s30  ;;  %s442_s24 = scalar_lea.hbm %s772_s1, 256 }
  0x34   : > { %p443_p2 = scmp.lt.u32.totalorder %s678_s7, %s772_s1  ;;  %p444_p4 = scmp.lt.u32.totalorder %s442_s24, %s437_s30 }
  0x35   : > { %p440_p12 = pnand %p438_p11, %p409_p3  ;;  %p446_p8 = scmp.lt.u32.totalorder %s437_s30, %s678_s7 }
  0x36   : > { %p445_p5 = por %p444_p4, %p443_p2 }
  0x37   : > { %p441_p10 = pneg %p440_p12 }
  0x38   : > { %p447_p9 = por %p446_p8, %p445_p5 }
  0x3a   : > { %p448_p0 = pnand %p447_p9, %p441_p10 }
  0x3c   : > { %451 = shalt.err (!%p448_p0)
}
  0x3d   : > { %s452_s23 = scalar_lea.vmem %s147_s14, 128  ;;  %s540_s25 = smov [#allocation5]  }
  0x3e   : > { %p453_p1 = scmp.ne.s32.totalorder %s147_s14, %s452_s23  ;;  %s457_s26 = sshll.u32 %s540_s25, 4  ;;  %s458_s26 = int_to_ptr.vmem [resolvable:$false] %s457_s26 }
  0x3f   : > { %s459_s27 = scalar_lea.vmem %s458_s26, 256  ;;  %p460_p6 = scmp.lt.s32.totalorder %s147_s14, %s458_s26 }
  0x40   : > { %p455_p11 = pnand %p453_p1, %p409_p3  ;;  %p461_p7 = scmp.lt.s32.totalorder %s459_s27, %s452_s23 }
  0x42   : > { %p456_p12 = pneg %p455_p11  ;;  %p462_p2 = por %p461_p7, %p460_p6 }
  0x44   : > { %p463_p4 = pnand %p462_p2, %p456_p12 }
  0x46   : > { %466 = shalt.err (!%p463_p4)
}
  0x47   : > { %362 = dma.hbm_to_vmem [thread:$0]  (!%p631_p13), %s678_s7, 128, %s147_s14, %s136_s28  }
  0x48   : > { %p784_p10 = scmp.ne.s32.totalorder %s783_s29, 0 }
  0x49   : > { %s705_s5 = sand.u32 (!%p784_p10), 1, %s529_s10   ;;  %p785_p6 = scmp.ne.s32.totalorder (!%p784_p10), %s777_s20, 0 }
  0x4a   : > { %155 = sbr.rel (%p784_p10) target bundleno = 161 (0xa1), region = 28  ;;  %s708_s6 = sshll.u32 (!%p784_p10), %s705_s5, 3 }
  0x4b   : > { %s158_s8 = scalar_lea.sflag (!%p784_p10), [#allocation3], %s705_s5  ;;  %s161_s30 = scalar_lea.vmem (!%p784_p10), [#allocation2], %s708_s6 }
  0x51   : > { %512 = dma.done.wait (%p785_p6), %s158_s8, 128  }
  0x52   : > { %514 = vsyncadd (%p785_p6), %s158_s8, 4294967168  ;;  %s167_s3 = scalar_lea.sflag [#allocation6], %s705_s5  ;;  %s170_s29 = scalar_lea.vmem [#allocation5], %s708_s6 }
  0x53   : > { %516 = dma.done.wait (%p785_p6), %s167_s3, 128  }
  0x54   : > { %518 = vsyncadd (%p785_p6), %s167_s3, 4294967168  ;;  %v196_v0 = vld [vmem:[%s161_s30] sm:$0xff]  ;;  %v197_v7 = vld [vmem:[%s170_s29] sm:$0xff]  ;;  %s195_s20 = scalar_lea.vmem [#allocation7], %s708_s6  ;;  %s347_s14 = sshll.u32 %s578_s13, 7 }
  0x55   : > { %v201_v1 = vand.u32 2147483647, %v196_v0  ;;  %v198_v9 = vmax.f32 %v196_v0, 0.0  ;;  %v199_v10 = vmul.f32 %v197_v7, %v196_v0  ;;  %v218_v20 = vmul.f32 -0.5, %v197_v7  ;;  %s242_s7 = sshll.u32 %s195_s20, 4  ;;  %s729_s16 = scalar_lea.hbm %s773_s2, %s347_s14  ;;  %s724_s7 = int_to_ptr.vmem [resolvable:$true] %s242_s7 }
  0x56   : > { %s229_s24 = scalar_lea.sflag [#allocation4], %s705_s5  ;;  %s467_s17 = scalar_lea.vmem %s724_s7, 128 }
  0x57   : > { %v202_v2 = vsub.f32 0.0, %v201_v1  ;;  %v200_v14 = vsub.f32 %v198_v9, %v199_v10  ;;  %v219_v23 = vadd.f32 0.75, %v218_v20  ;;  %p468_p13 = scmp.ne.s32.totalorder %s724_s7, %s467_s17  ;;  %p786_p3 = scmp.ne.s32.totalorder %s778_s21, 0 }
  0x58   : > { %s541_s13 = smov [#allocation7]  }
  0x59   : > { %v203_v3 = vmul.f32 1.442695, %v202_v2  ;;  %p469_p7 = pnand %p468_p13, %p786_p3  ;;  %s471_s19 = sshll.u32 %s541_s13, 4  ;;  %s472_s19 = int_to_ptr.vmem [resolvable:$false] %s471_s19 }
  0x5a   : > { %s473_s23 = scalar_lea.vmem %s472_s19, 256  ;;  %p474_p8 = scmp.lt.s32.totalorder %s724_s7, %s472_s19 }
  0x5b   : > { %401 = vpow2.f32 %v203_v3  ;;  %p470_p5 = pneg %p469_p7  ;;  %p475_p9 = scmp.lt.s32.totalorder %s473_s23, %s467_s17 }
  0x5d   : > { %p476_p0 = por %p475_p9, %p474_p8 }
  0x5f   : > { %p477_p1 = pnand %p476_p0, %p470_p5 }
  0x65   : > { %v402_v4 = vpop.eup %401 }
  0x66   : > { %v205_v5 = vadd.f32 1.0, %v402_v4  ;;  %v208_v6 = vmul.f32 -0.5, %v402_v4  ;;  %v211_v11 = vand.u32 2147483647, %v402_v4 }
  0x68   : > { %403 = vlog2.f32 %v205_v5  ;;  %v209_v8 = vadd.f32 1.0, %v208_v6  ;;  %vm212_vm0 = vcmp.lt.f32.partialorder %v211_v11, 0.0004427343 }
  0x6a   : > { %v210_v12 = vmul.f32 %v402_v4, %v209_v8 }
  0x72   : > { %v404_v13 = vpop.eup %403 }
  0x73   : > { %v207_v15 = vmul.f32 0.6931472, %v404_v13 }
  0x75   : > { %v213_v16 = vsel %vm212_vm0, %v210_v12, %v207_v15 }
  0x76   : > { %v214_v17 = vadd.f32 %v213_v16, %v200_v14 }
  0x78   : > { %v215_v18 = vsub.f32 0.0, %v214_v17 }
  0x7a   : > { %v216_v19 = vmul.f32 1.442695, %v215_v18 }
  0x7c   : > { %405 = vpow2.f32 %v216_v19 }
  0x86   : > { %v406_v21 = vpop.eup %405 }
  0x87   : > { %v220_v22 = vsub.f32 1.0, %v406_v21 }
  0x89   : > { %v221_v24 = vmax.f32 %v220_v22, 0.0 }
  0x8b   : > { %v222_v25 = vmul.f32 %v221_v24, %v221_v24 }
  0x8d   : > { %v223_v26 = vmul.f32 %v222_v25, %v219_v23 }
  0x8f   : > { %v224_v27 = vmul.f32 %v223_v26, %v214_v17 }
  0x91   : > { %v226_v28 = vmul.f32 0.00048828125, %v224_v27 }
  0x93   : > { %227 = vst [vmem:[%s195_s20] sm:$0xff] %v226_v28 }
  0x94   : > { %480 = shalt.err (!%p477_p1)
}
  0x95   : > { %s481_s25 = scalar_lea.hbm %s729_s16, 128  ;;  %s485_s5 = scalar_lea.hbm %s773_s2, 256 }
  0x96   : > { %p482_p11 = scmp.ne.s32.totalorder %s729_s16, %s481_s25  ;;  %p486_p4 = scmp.lt.u32.totalorder %s729_s16, %s773_s2 }
  0x97   : > { %p487_p10 = scmp.lt.u32.totalorder %s485_s5, %s481_s25  ;;  %p489_p13 = scmp.lt.u32.totalorder %s481_s25, %s729_s16 }
  0x98   : > { %p483_p12 = pnand %p482_p11, %p786_p3 }
  0x99   : > { %p488_p6 = por %p487_p10, %p486_p4 }
  0x9a   : > { %p484_p2 = pneg %p483_p12 }
  0x9b   : > { %p490_p7 = por %p489_p13, %p488_p6 }
  0x9d   : > { %p491_p5 = pnand %p490_p7, %p484_p2 }
  0x9f   : > { %494 = shalt.err (!%p491_p5)
}
  0xa0   : > { %354 = dma.vmem_to_hbm [thread:$0]  (%p786_p3), %s724_s7, 128, %s729_s16, %s229_s24  }
  0xa1 PF: > { %s254_s30 = sand.u32 1, %s525_s9   ;;  %p787_p8 = scmp.ne.s32.totalorder %s779_s22, 0 }
  0xa2   : > { %p788_p9 = scmp.ge.s32.totalorder %s537_s12, 2  ;;  %s255_s3 = scalar_lea.sflag [#allocation4], %s254_s30 }
  0xa4   : > { %p364_p0 = pnand %p788_p9, %p787_p8 }
  0xa6   : > { %520 = dma.done.wait (!%p364_p0), %s255_s3, 128  }
  0xa7   : > { %522 = vsyncadd (!%p364_p0), %s255_s3, 4294967168  ;;  %p18_p1 = scmp.ge.s32.totalorder %s582_s15, 4   ;;  %s789_s9 = smov %s529_s10 }
  0xa8   : > { %s790_s10 = smov %s533_s11  ;;  %s791_s11 = smov %s594_s18 }
  0xa9   : > { %s792_s12 = smov %s582_s15  ;;  %20 = sbr.rel (!%p18_p1) target bundleno = 7 (0x7), region = 86 }
  0xb0   :  { %260 = vsyncpa [#allocation3], 1 }
  0xb1   :  { %262 = vsyncpa [#allocation3 + $0x1], 1 }
  0xb2   :  { %263 = vsyncpa [#allocation6], 1 }
  0xb3   :  { %265 = vsyncpa [#allocation6 + $0x1], 1 }
  0xb4   :  { %266 = vsyncpa [#allocation4], 1 }
  0xb5   :  { %268 = vsyncpa [#allocation4 + $0x1], 1 }

</bundles_post_ra>
